<compile_context>
chip_gen: v7x
topology: tpu7x:2x2x1
jax: 0.10.0
libtpu: 0.0.40
codegen_flags: <defaults>
</compile_context>

<pallas_src>
import jax
import jax.numpy as jnp
from jax.experimental import pallas as pl
from jax.experimental.pallas import tpu as pltpu

LANE = 128


def _round_up(n, m):
    return ((n + m - 1) // m) * m


def _pad_to(a, rows, cols):
    pr, pc = rows - a.shape[0], cols - a.shape[1]
    if pr == 0 and pc == 0:
        return a
    return jnp.pad(a, ((0, pr), (0, pc)))


def _adaptive_routine_kernel(
    x_ref, tgt_ref, prev_ref,
    w1_ref, b1_ref, tau_ref, w2_ref, b2_ref,
    spikes_ref, err_ref, state_ref,
):
    x = x_ref[...]
    tgt = tgt_ref[...]
    prev = prev_ref[...]

    # --- SurpriseMinimization: per-tile partial L1 sum (zero padding contributes 0).
    # The mean (global element count!) is taken in the wrapper.
    err_ref[0, 0] = jnp.sum(jnp.abs(x - tgt))

    # --- folded SML fc + LTC fc_in:  h_in = x @ W1 + b1
    h_in = jnp.dot(x, w1_ref[...], preferred_element_type=jnp.float32) + b1_ref[...]

    # --- liquid time-constant state update
    state = prev + tau_ref[...] * (h_in - prev)

    # --- folded LTC fc_out + SNN fc:  membrane = state @ W2 + b2
    membrane = jnp.dot(state, w2_ref[...], preferred_element_type=jnp.float32) + b2_ref[...]

    # --- spiking threshold
    spikes_ref[...] = (membrane >= 1.0).astype(jnp.float32)
    state_ref[...] = state


@jax.jit
def adaptive_routine_forward(x, target, prev_state, params):
    """Fused forward. x/target: (B, in), prev_state: (B, hidden).
    (PyTorch target=None -> pass target=x, surprise==0; prev_state=None -> pass zeros.)"""
    B, in_size = x.shape
    hidden = params["w_in"].shape[1]
    out_size = params["w_snn"].shape[1]

    # ---- algebraic fold (one-time, wrapper side) ----
    w1 = params["w_sml"] @ params["w_in"]                          # (in, hidden)
    b1 = params["b_sml"] @ params["w_in"] + params["b_in"]         # (1, hidden)
    w2 = params["w_out"] @ params["w_snn"]                         # (hidden, out)
    b2 = params["b_out"] @ params["w_snn"] + params["b_snn"]       # (1, out)

    # ---- lane-dense padding of feature dims ----
    in_p = _round_up(in_size, LANE)
    hid_p = _round_up(hidden, LANE)
    out_p = _round_up(out_size, LANE)

    # ---- batch tiling (bounded VMEM footprint; fine for v7x's 64 MiB) ----
    tile_b = min(_round_up(B, 8), 512)
    b_pad = _round_up(B, tile_b)
    num_tiles = b_pad // tile_b

    x_p = _pad_to(x, b_pad, in_p)
    t_p = _pad_to(target, b_pad, in_p)
    s_p = _pad_to(prev_state, b_pad, hid_p)
    w1_p = _pad_to(w1, in_p, hid_p)
    b1_p = _pad_to(b1, 1, hid_p)
    tau_p = _pad_to(params["tau"], 1, hid_p)
    w2_p = _pad_to(w2, hid_p, out_p)
    b2_p = _pad_to(b2, 1, out_p)

    grid_spec = pltpu.PrefetchScalarGridSpec(
        num_scalar_prefetch=0,
        grid=(num_tiles,),
        in_specs=[
            pl.BlockSpec((tile_b, in_p), lambda i: (i, 0)),    # x
            pl.BlockSpec((tile_b, in_p), lambda i: (i, 0)),    # target
            pl.BlockSpec((tile_b, hid_p), lambda i: (i, 0)),   # prev_state
            pl.BlockSpec((in_p, hid_p), lambda i: (0, 0)),     # W1 (resident)
            pl.BlockSpec((1, hid_p), lambda i: (0, 0)),        # b1
            pl.BlockSpec((1, hid_p), lambda i: (0, 0)),        # tau
            pl.BlockSpec((hid_p, out_p), lambda i: (0, 0)),    # W2 (resident)
            pl.BlockSpec((1, out_p), lambda i: (0, 0)),        # b2
        ],
        out_specs=[
            pl.BlockSpec((tile_b, out_p), lambda i: (i, 0)),   # spikes (lane-dense)
            pl.BlockSpec((1, 1), lambda i: (i, 0),
                         memory_space=pltpu.MemorySpace.SMEM), # per-tile |x-t| sums
            pl.BlockSpec((tile_b, hid_p), lambda i: (i, 0)),   # new state (lane-dense)
        ],
    )

    out_shapes = (
        jax.ShapeDtypeStruct((b_pad, out_p), jnp.float32),
        jax.ShapeDtypeStruct((num_tiles, 1), jnp.float32),
        jax.ShapeDtypeStruct((b_pad, hid_p), jnp.float32),
    )

    spikes_p, err_partial, state_p = pl.pallas_call(
        _adaptive_routine_kernel,
        out_shape=out_shapes,
        grid_spec=grid_spec,
        input_output_aliases={2: 2},  # prev_state HBM buffer reused for new state
        compiler_params=pltpu.CompilerParams(
            dimension_semantics=("parallel",),  # batch tiles shard across TCs on v7x
        ),
    )(x_p, t_p, s_p, w1_p, b1_p, tau_p, w2_p, b2_p)

    # surprise = mean over the *global* (unpadded) element count
    surprise = jnp.sum(err_partial) / jnp.float32(B * in_size)
    return spikes_p[:B, :out_size], surprise, state_p[:B, :hidden]


def init_params(key, input_size, hidden_size, output_size):
    """Deterministic synthetic parameters (shapes follow the PyTorch module)."""
    ks = jax.random.split(key, 9)

    def linear(kw, kb, fan_in, fan_out):
        bound = 1.0 / (fan_in ** 0.5)
        w = jax.random.uniform(kw, (fan_in, fan_out), jnp.float32, -bound, bound)  # (in,out)
        b = jax.random.uniform(kb, (1, fan_out), jnp.float32, -bound, bound)
        return w, b

    w_sml, b_sml = linear(ks[0], ks[1], input_size, input_size)
    w_in, b_in = linear(ks[2], ks[3], input_size, hidden_size)
    w_out, b_out = linear(ks[4], ks[5], hidden_size, hidden_size)
    w_snn, b_snn = linear(ks[6], ks[7], hidden_size, output_size)
    tau = jax.random.uniform(ks[8], (1, hidden_size), jnp.float32) * 0.1

    return dict(
        w_sml=w_sml, b_sml=b_sml,
        w_in=w_in, b_in=b_in, tau=tau,
        w_out=w_out, b_out=b_out,
        w_snn=w_snn, b_snn=b_snn,
    )


def reference_forward(x, target, prev_state, p):
    """Pure-JAX reference mirroring the PyTorch semantics (unfused)."""
    surprise = jnp.mean(jnp.abs(x - target))
    prediction = x @ p["w_sml"] + p["b_sml"]
    h_in = prediction @ p["w_in"] + p["b_in"]
    state = prev_state + p["tau"] * (h_in - prev_state)
    ltc_out = state @ p["w_out"] + p["b_out"]
    membrane = ltc_out @ p["w_snn"] + p["b_snn"]
    spikes = (membrane >= 1.0).astype(jnp.float32)
    return spikes, surprise, state, membrane


if __name__ == "__main__":
    batch, input_size, hidden_size, output_size = 8, 16, 32, 8

    key = jax.random.PRNGKey(0)
    k_x, k_t, k_s, k_p = jax.random.split(key, 4)

    x = jax.random.normal(k_x, (batch, input_size), jnp.float32)
    target = jax.random.normal(k_t, (batch, input_size), jnp.float32)
    prev_state = jax.random.normal(k_s, (batch, hidden_size), jnp.float32) * 0.1
    params = init_params(k_p, input_size, hidden_size, output_size)

    spikes, surprise, state = adaptive_routine_forward(x, target, prev_state, params)
    jax.block_until_ready((spikes, surprise, state))

    ref_spikes, ref_surprise, ref_state, ref_membrane = reference_forward(
        x, target, prev_state, params)

    assert jnp.allclose(surprise, ref_surprise, atol=1e-6), "surprise mismatch"
    assert jnp.allclose(state, ref_state, atol=1e-5), "state mismatch"
    # Folded matmuls change rounding slightly; only compare spikes whose reference
    # membrane is not right at the hard threshold.
    borderline = jnp.abs(ref_membrane - 1.0) < 1e-4
    assert bool(jnp.all((spikes == ref_spikes) | borderline)), "spikes mismatch"

    print("KERNEL_OK")
</pallas_src>

<mosaic_0001>
module attributes {stable_mosaic.version = 11 : i64} {
  func.func @_adaptive_routine_kernel(%arg0: i32, %arg1: memref<8x128xf32, #tpu.memory_space<vmem>>, %arg2: memref<8x128xf32, #tpu.memory_space<vmem>>, %arg3: memref<8x128xf32, #tpu.memory_space<vmem>>, %arg4: memref<128x128xf32, #tpu.memory_space<vmem>>, %arg5: memref<1x128xf32, #tpu.memory_space<vmem>>, %arg6: memref<1x128xf32, #tpu.memory_space<vmem>>, %arg7: memref<128x128xf32, #tpu.memory_space<vmem>>, %arg8: memref<1x128xf32, #tpu.memory_space<vmem>>, %arg9: memref<8x128xf32, #tpu.memory_space<vmem>>, %arg10: memref<1x1xf32, #tpu.memory_space<smem>>, %arg11: memref<8x128xf32, #tpu.memory_space<vmem>>) attributes {dimension_semantics = [#tpu.dimension_semantics<parallel>], iteration_bounds = array<i64: 1>, scalar_prefetch = 0 : i64, scratch_operands = 0 : i64, tpu.core_type = #tpu.core_type<tc>, window_params = [{transform_indices = @transform_0, window_bounds = array<i64: 8, 128>}, {transform_indices = @transform_1, window_bounds = array<i64: 8, 128>}, {transform_indices = @transform_2, window_bounds = array<i64: 8, 128>}, {pipeline_mode = #tpu.pipeline_mode<synchronous>, transform_indices = @transform_3, window_bounds = array<i64: 128, 128>}, {pipeline_mode = #tpu.pipeline_mode<synchronous>, transform_indices = @transform_4, window_bounds = array<i64: 1, 128>}, {pipeline_mode = #tpu.pipeline_mode<synchronous>, transform_indices = @transform_5, window_bounds = array<i64: 1, 128>}, {pipeline_mode = #tpu.pipeline_mode<synchronous>, transform_indices = @transform_6, window_bounds = array<i64: 128, 128>}, {pipeline_mode = #tpu.pipeline_mode<synchronous>, transform_indices = @transform_7, window_bounds = array<i64: 1, 128>}, {transform_indices = @transform_8, window_bounds = array<i64: 8, 128>}, {transform_indices = @transform_9, window_bounds = array<i64: 1, 1>}, {transform_indices = @transform_10, window_bounds = array<i64: 8, 128>}]} {
    %c0 = arith.constant 0 : index
    %c0_0 = arith.constant 0 : index
    %0 = vector.load %arg1[%c0, %c0_0] : memref<8x128xf32, #tpu.memory_space<vmem>>, vector<8x128xf32>
    %c0_1 = arith.constant 0 : index
    %c0_2 = arith.constant 0 : index
    %1 = vector.load %arg2[%c0_1, %c0_2] : memref<8x128xf32, #tpu.memory_space<vmem>>, vector<8x128xf32>
    %c0_3 = arith.constant 0 : index
    %c0_4 = arith.constant 0 : index
    %2 = vector.load %arg3[%c0_3, %c0_4] : memref<8x128xf32, #tpu.memory_space<vmem>>, vector<8x128xf32>
    %3 = arith.subf %0, %1 : vector<8x128xf32>
    %4 = math.absf %3 : vector<8x128xf32>
    %5 = vector.shape_cast %4 : vector<8x128xf32> to vector<1x8x128xf32>
    %cst = arith.constant dense<0.000000e+00> : vector<1xf32>
    %6 = vector.multi_reduction <add>, %5, %cst [1, 2] : vector<1x8x128xf32> to vector<1xf32>
    %7 = vector.shape_cast %6 : vector<1xf32> to vector<1x1x1xf32>
    %8 = vector.extract %7[0, 0, 0] : f32 from vector<1x1x1xf32>
    %c0_5 = arith.constant 0 : index
    %c0_6 = arith.constant 0 : index
    %9 = memref.load %arg10[%c0_5, %c0_6] : memref<1x1xf32, #tpu.memory_space<smem>>
    memref.store %8, %arg10[%c0_5, %c0_6] : memref<1x1xf32, #tpu.memory_space<smem>>
    %c0_7 = arith.constant 0 : index
    %c0_8 = arith.constant 0 : index
    %10 = vector.load %arg4[%c0_7, %c0_8] : memref<128x128xf32, #tpu.memory_space<vmem>>, vector<128x128xf32>
    %cst_9 = arith.constant dense<0.000000e+00> : vector<8x128xf32>
    %11 = tpu.matmul %0, %10, %cst_9 {dimension_numbers = #tpu.dot_dimension_numbers<[1], [0], [0], [1], [0, 0, 1, 1], [], []>} : vector<8x128xf32>, vector<128x128xf32>, vector<8x128xf32> -> vector<8x128xf32>
    %c0_10 = arith.constant 0 : index
    %c0_11 = arith.constant 0 : index
    %12 = vector.load %arg5[%c0_10, %c0_11] : memref<1x128xf32, #tpu.memory_space<vmem>>, vector<1x128xf32>
    %13 = vector.broadcast %12 : vector<1x128xf32> to vector<8x128xf32>
    %14 = arith.addf %11, %13 : vector<8x128xf32>
    %c0_12 = arith.constant 0 : index
    %c0_13 = arith.constant 0 : index
    %15 = vector.load %arg6[%c0_12, %c0_13] : memref<1x128xf32, #tpu.memory_space<vmem>>, vector<1x128xf32>
    %16 = arith.subf %14, %2 : vector<8x128xf32>
    %17 = vector.broadcast %15 : vector<1x128xf32> to vector<8x128xf32>
    %18 = arith.mulf %17, %16 : vector<8x128xf32>
    %19 = arith.addf %2, %18 : vector<8x128xf32>
    %c0_14 = arith.constant 0 : index
    %c0_15 = arith.constant 0 : index
    %20 = vector.load %arg7[%c0_14, %c0_15] : memref<128x128xf32, #tpu.memory_space<vmem>>, vector<128x128xf32>
    %cst_16 = arith.constant dense<0.000000e+00> : vector<8x128xf32>
    %21 = tpu.matmul %19, %20, %cst_16 {dimension_numbers = #tpu.dot_dimension_numbers<[1], [0], [0], [1], [0, 0, 1, 1], [], []>} : vector<8x128xf32>, vector<128x128xf32>, vector<8x128xf32> -> vector<8x128xf32>
    %c0_17 = arith.constant 0 : index
    %c0_18 = arith.constant 0 : index
    %22 = vector.load %arg8[%c0_17, %c0_18] : memref<1x128xf32, #tpu.memory_space<vmem>>, vector<1x128xf32>
    %23 = vector.broadcast %22 : vector<1x128xf32> to vector<8x128xf32>
    %24 = arith.addf %21, %23 : vector<8x128xf32>
    %cst_19 = arith.constant 1.000000e+00 : f32
    %25 = vector.broadcast %cst_19 : f32 to vector<8x128xf32>
    %26 = arith.cmpf oge, %24, %25 : vector<8x128xf32>
    %27 = arith.extui %26 : vector<8x128xi1> to vector<8x128xi32>
    %28 = arith.sitofp %27 : vector<8x128xi32> to vector<8x128xf32>
    %c0_20 = arith.constant 0 : index
    %c0_21 = arith.constant 0 : index
    %29 = vector.load %arg9[%c0_20, %c0_21] : memref<8x128xf32, #tpu.memory_space<vmem>>, vector<8x128xf32>
    tpu.vector_store %arg9[%c0_20, %c0_21], %28 {strides = array<i32>} : memref<8x128xf32, #tpu.memory_space<vmem>>, vector<8x128xf32>,
    %c0_22 = arith.constant 0 : index
    %c0_23 = arith.constant 0 : index
    %30 = vector.load %arg11[%c0_22, %c0_23] : memref<8x128xf32, #tpu.memory_space<vmem>>, vector<8x128xf32>
    tpu.vector_store %arg11[%c0_22, %c0_23], %19 {strides = array<i32>} : memref<8x128xf32, #tpu.memory_space<vmem>>, vector<8x128xf32>,
    return
  }
  func.func @transform_0(%arg0: i32) -> (i32, i32) {
    %c0_i32 = arith.constant 0 : i32
    %c0_i32_0 = arith.constant 0 : i32
    return %arg0, %c0_i32 : i32, i32
  }
  func.func @transform_1(%arg0: i32) -> (i32, i32) {
    %c0_i32 = arith.constant 0 : i32
    %c0_i32_0 = arith.constant 0 : i32
    return %arg0, %c0_i32 : i32, i32
  }
  func.func @transform_2(%arg0: i32) -> (i32, i32) {
    %c0_i32 = arith.constant 0 : i32
    %c0_i32_0 = arith.constant 0 : i32
    return %arg0, %c0_i32 : i32, i32
  }
  func.func @transform_3(%arg0: i32) -> (i32, i32) {
    %c0_i32 = arith.constant 0 : i32
    %c0_i32_0 = arith.constant 0 : i32
    %c0_i32_1 = arith.constant 0 : i32
    return %c0_i32, %c0_i32_0 : i32, i32
  }
  func.func @transform_4(%arg0: i32) -> (i32, i32) {
    %c0_i32 = arith.constant 0 : i32
    %c0_i32_0 = arith.constant 0 : i32
    %c0_i32_1 = arith.constant 0 : i32
    return %c0_i32, %c0_i32_0 : i32, i32
  }
  func.func @transform_5(%arg0: i32) -> (i32, i32) {
    %c0_i32 = arith.constant 0 : i32
    %c0_i32_0 = arith.constant 0 : i32
    %c0_i32_1 = arith.constant 0 : i32
    return %c0_i32, %c0_i32_0 : i32, i32
  }
  func.func @transform_6(%arg0: i32) -> (i32, i32) {
    %c0_i32 = arith.constant 0 : i32
    %c0_i32_0 = arith.constant 0 : i32
    %c0_i32_1 = arith.constant 0 : i32
    return %c0_i32, %c0_i32_0 : i32, i32
  }
  func.func @transform_7(%arg0: i32) -> (i32, i32) {
    %c0_i32 = arith.constant 0 : i32
    %c0_i32_0 = arith.constant 0 : i32
    %c0_i32_1 = arith.constant 0 : i32
    return %c0_i32, %c0_i32_0 : i32, i32
  }
  func.func @transform_8(%arg0: i32) -> (i32, i32) {
    %c0_i32 = arith.constant 0 : i32
    %c0_i32_0 = arith.constant 0 : i32
    return %arg0, %c0_i32 : i32, i32
  }
  func.func @transform_9(%arg0: i32) -> (i32, i32) {
    %c0_i32 = arith.constant 0 : i32
    %c0_i32_0 = arith.constant 0 : i32
    return %arg0, %c0_i32 : i32, i32
  }
  func.func @transform_10(%arg0: i32) -> (i32, i32) {
    %c0_i32 = arith.constant 0 : i32
    %c0_i32_0 = arith.constant 0 : i32
    return %arg0, %c0_i32 : i32, i32
  }
}

</mosaic_0001>

<bundles_post_ra>
// kernel: adaptive_routine_forward.1
= control target key start
LH: loop header
LB: loop body
LE: loop exit
PB: predicated region body
PF: predicated region fallthrough
CT: control target
= control target key end

     0   :  { %16 = vsyncpa [#allocation3], 0  ;;  %v481_v3 = vmov 0.0|0.0   ;;  %vm482_vm0 = vmmov 0   ;;  %v483_v6 = vmov 0.0   ;;  %s701_s0 = inlined_call_operand.vmem [shape: f32[8,128], index: 0, kind: input, shape index: {}]   ;;  %s702_s1 = inlined_call_operand.vmem [shape: f32[8,128], index: 1, kind: input, shape index: {}]   ;;  %s703_s2 = inlined_call_operand.vmem [shape: f32[8,128], index: 2, kind: input, shape index: {}, may-alias: {2,10}]   ;;  %s704_s3 = inlined_call_operand.vmem [shape: f32[128,128], index: 3, kind: input, shape index: {}]   ;;  %s705_s4 = inlined_call_operand.vmem [shape: f32[1,128], index: 4, kind: input, shape index: {}]   ;;  %s706_s5 = inlined_call_operand.vmem [shape: f32[1,128], index: 5, kind: input, shape index: {}]   ;;  %s707_s6 = inlined_call_operand.vmem [shape: f32[128,128], index: 6, kind: input, shape index: {}]   ;;  %s708_s7 = inlined_call_operand.vmem [shape: f32[1,128], index: 7, kind: input, shape index: {}]   ;;  %s709_s8 = inlined_call_operand.hbm [shape: f32[8,128], index: 8, kind: output, shape index: {0}]   ;;  %s710_s9 = inlined_call_operand.hbm [shape: f32[1,1], index: 9, kind: output, shape index: {1}]   ;;  %s711_s10 = inlined_call_operand.vmem [shape: f32[8,128], index: 10, kind: output, shape index: {2}, may-alias: {2,10}]  }
   0x1   :  { %v50_v0 = vld [vmem:[%s704_s3] sm:$0xff]  ;;  %v51_v1 = vld [vmem:[%s704_s3 + $0x8] sm:$0xff]  ;;  %v52_v2 = vld [vmem:[%s704_s3 + $0x10] sm:$0xff]  ;;  %390 = vmatprep.subr.bf16.mxu0 %v481_v3  ;;  %352 = vmatprep.mubr.msk.f32.mxu0 %vm482_vm0, %v483_v6 }
   0x2   :  { %v391_v4 = vpack.c.bf16 %v51_v1, %v50_v0  ;;  %v53_v5 = vld [vmem:[%s704_s3 + $0x18] sm:$0xff]  ;;  %414 = vmatprep.subr.bf16.mxu1 %v481_v3  ;;  %387 = vmatprep.mubr.msk.f32.mxu1 %vm482_vm0, %v483_v6  ;;  %v54_v8 = vld [vmem:[%s704_s3 + $0x20] sm:$0xff]  ;;  %v55_v9 = vld [vmem:[%s704_s3 + $0x28] sm:$0xff] }
   0x3   :  { %v394_v7 = vpack.c.bf16 %v53_v5, %v52_v2  ;;  %v153_v10 = vld [vmem:[%s707_s6] sm:$0xff]  ;;  %v154_v11 = vld [vmem:[%s707_s6 + $0x8] sm:$0xff]  ;;  %v155_v12 = vld [vmem:[%s707_s6 + $0x10] sm:$0xff]  ;;  %v397_v14 = vpack.c.bf16 %v55_v9, %v54_v8 }
   0x4   :  { %392 = vmatpush3.bf16.msra.mxu0 %v391_v4  ;;  %v156_v13 = vld [vmem:[%s707_s6 + $0x18] sm:$0xff]  ;;  %v415_v15 = vpack.c.bf16 %v154_v11, %v153_v10  ;;  %v56_v16 = vld [vmem:[%s704_s3 + $0x30] sm:$0xff]  ;;  %v157_v19 = vld [vmem:[%s707_s6 + $0x20] sm:$0xff] }
   0x5   :  { %393 = vmatprep.subr.bf16.mxu0 %v481_v3  ;;  %v57_v17 = vld [vmem:[%s704_s3 + $0x38] sm:$0xff]  ;;  %v418_v18 = vpack.c.bf16 %v156_v13, %v155_v12  ;;  %v158_v20 = vld [vmem:[%s707_s6 + $0x28] sm:$0xff] }
   0x6   :  { %416 = vmatpush3.bf16.msra.mxu1 %v415_v15 }
   0x7   :  { %417 = vmatprep.subr.bf16.mxu1 %v481_v3 }
   0x8   :  { %395 = vmatpush3.bf16.msra.mxu0 %v394_v7 }
   0x9   :  { %396 = vmatprep.subr.bf16.mxu0 %v481_v3 }
   0xa   :  { %17 = vsyncpa [#allocation4], 0  ;;  %v400_v21 = vpack.c.bf16 %v57_v17, %v56_v16  ;;  %v58_v22 = vld [vmem:[%s704_s3 + $0x40] sm:$0xff]  ;;  %v59_v23 = vld [vmem:[%s704_s3 + $0x48] sm:$0xff]  ;;  %419 = vmatpush3.bf16.msra.mxu1 %v418_v18  ;;  %v421_v24 = vpack.c.bf16 %v158_v20, %v157_v19  ;;  %s445_s25 = scalar_lea.hbm %s710_s9, 16 }
   0xb   :  { %420 = vmatprep.subr.bf16.mxu1 %v481_v3  ;;  %v159_v25 = vld [vmem:[%s707_s6 + $0x30] sm:$0xff]  ;;  %v160_v26 = vld [vmem:[%s707_s6 + $0x38] sm:$0xff]  ;;  %v403_v27 = vpack.c.bf16 %v59_v23, %v58_v22  ;;  %v161_v31 = vld [vmem:[%s707_s6 + $0x40] sm:$0xff]  ;;  %p446_p0 = scmp.ne.s32.totalorder %s710_s9, %s445_s25  ;;  %p449_p1 = scmp.lt.u32.totalorder %s445_s25, %s710_s9 }
   0xc   :  { %398 = vmatpush3.bf16.msra.mxu0 %v397_v14  ;;  %v60_v28 = vld [vmem:[%s704_s3 + $0x50] sm:$0xff]  ;;  %v61_v29 = vld [vmem:[%s704_s3 + $0x58] sm:$0xff]  ;;  %v424_v30 = vpack.c.bf16 %v160_v26, %v159_v25  ;;  %v162_v32 = vld [vmem:[%s707_s6 + $0x48] sm:$0xff] }
   0xd   :  { %399 = vmatprep.subr.bf16.mxu0 %v481_v3  ;;  %v406_v33 = vpack.c.bf16 %v61_v29, %v60_v28  ;;  %v62_v34 = vld [vmem:[%s704_s3 + $0x60] sm:$0xff]  ;;  %v63_v35 = vld [vmem:[%s704_s3 + $0x68] sm:$0xff]  ;;  %v427_v36 = vpack.c.bf16 %v162_v32, %v161_v31  ;;  %v163_v37 = vld [vmem:[%s707_s6 + $0x50] sm:$0xff]  ;;  %p451_p2 = pnand %p449_p1, %p446_p0 }
   0xe   :  { %422 = vmatpush3.bf16.msra.mxu1 %v421_v24  ;;  %v164_v38 = vld [vmem:[%s707_s6 + $0x58] sm:$0xff]  ;;  %v409_v39 = vpack.c.bf16 %v63_v35, %v62_v34  ;;  %v64_v40 = vld [vmem:[%s704_s3 + $0x70] sm:$0xff]  ;;  %v34_v44 = vld [vmem:[%s701_s0] sm:$0xff] }
   0xf   :  { %423 = vmatprep.subr.bf16.mxu1 %v481_v3  ;;  %v65_v41 = vld [vmem:[%s704_s3 + $0x78] sm:$0xff]  ;;  %v430_v42 = vpack.c.bf16 %v164_v38, %v163_v37  ;;  %v165_v45 = vld [vmem:[%s707_s6 + $0x60] sm:$0xff]  ;;  %v166_v46 = vld [vmem:[%s707_s6 + $0x68] sm:$0xff] }
  0x10   :  { %401 = vmatpush3.bf16.msra.mxu0 %v400_v21  ;;  %v412_v43 = vpack.c.bf16 %v65_v41, %v64_v40  ;;  %v433_v47 = vpack.c.bf16 %v166_v46, %v165_v45  ;;  %v167_v48 = vld [vmem:[%s707_s6 + $0x70] sm:$0xff]  ;;  %v168_v49 = vld [vmem:[%s707_s6 + $0x78] sm:$0xff]  ;;  %v35_v51 = vld [vmem:[%s702_s1] sm:$0xff] }
  0x11   :  { %402 = vmatprep.subr.bf16.mxu0 %v481_v3  ;;  %v436_v50 = vpack.c.bf16 %v168_v49, %v167_v48  ;;  %v37_v52 = vsub.f32 %v34_v44, %v35_v51  ;;  %v282_v54 = vld [vmem:[%s705_s4] ss:$0 sm:$0xff] }
  0x12   :  { %425 = vmatpush3.bf16.msra.mxu1 %v424_v30  ;;  %v36_v55 = vld [vmem:[%s703_s2] sm:$0xff] }
  0x13   :  { %426 = vmatprep.subr.bf16.mxu1 %v481_v3  ;;  %v38_v53 = vand.u32 2147483647, %v37_v52  ;;  %v283_v59 = vld [vmem:[%s706_s5] ss:$0 sm:$0xff] }
  0x14   :  { %404 = vmatpush3.bf16.msra.mxu0 %v403_v27 }
  0x15   :  { %405 = vmatprep.subr.bf16.mxu0 %v481_v3  ;;  %39 = vadd.xlane.f32.xlu0 %v38_v53 }
  0x16   :  { %428 = vmatpush3.bf16.msra.mxu1 %v427_v36 }
  0x17   :  { %429 = vmatprep.subr.bf16.mxu1 %v481_v3 }
  0x18   :  { %407 = vmatpush3.bf16.msra.mxu0 %v406_v33 }
  0x19   :  { %408 = vmatprep.subr.bf16.mxu0 %v481_v3 }
  0x1a   :  { %431 = vmatpush3.bf16.msra.mxu1 %v430_v42 }
  0x1b   :  { %432 = vmatprep.subr.bf16.mxu1 %v481_v3 }
  0x1c   :  { %410 = vmatpush3.bf16.msra.mxu0 %v409_v39 }
  0x1d   :  { %411 = vmatprep.subr.bf16.mxu0 %v481_v3 }
  0x1e   :  { %434 = vmatpush3.bf16.msra.mxu1 %v433_v47 }
  0x1f   :  { %435 = vmatprep.subr.bf16.mxu1 %v481_v3 }
  0x20   :  { %413 = vmatpush3.bf16.msra.mxu0 %v412_v43 }
  0x22   :  { %437 = vmatpush3.bf16.msra.mxu1 %v436_v50 }
  0x23   :  { %353 = vmatmul.mubr.f32.vlgmr.msra.gmra.mrb[0].mxu0 %v34_v44 }
  0xa2   :  { %v40_v63 = vpop.xlane.xlu0 %39 }
  0xa3   :  { %v41_v0 = vrot.slane %v40_v63, 4 }
  0xa5   :  { %v42_v1 = vadd.f32 %v41_v0, %v40_v63 }
  0xa7   :  { %v43_v2 = vrot.slane %v42_v1, 2 }
  0xa9   :  { %v44_v3 = vadd.f32 %v43_v2, %v42_v1 }
  0xab   :  { %v45_v4 = vrot.slane %v44_v3, 1 }
  0xad   :  { %v46_v5 = vadd.f32 %v45_v4, %v44_v3 }
  0xaf   :  { %438 = vpush %v46_v5 }
  0xe0   :  { %s439_s2 = spop %438 }
  0xe1   :  { %49 = sst [smem:[#allocation5]] %s439_s2 }
  0xf6   :  { %v139_v56 = vpop.f32.mrb[0].mxu0 }
  0xf7   :  { %v140_v57 = vadd.f32 %v282_v54, %v139_v56  ;;  %v354_v58 = vpop.f32.mrb[1].mxu0 }
  0xf9   :  { %v144_v60 = vsub.f32 %v140_v57, %v36_v55 }
  0xfb   :  { %v151_v61 = vmul.f32 %v283_v59, %v144_v60 }
  0xfd   :  { %v152_v62 = vadd.f32 %v151_v61, %v36_v55 }
  0xff   :  { %388 = vmatmul.mubr.f32.vlgmr.msra.gmra.mrb[0].mxu1 %v152_v62  ;;  %250 = vst [vmem:[%s711_s10] sm:$0xff] %v152_v62 }
 0x100   :  { %454 = shalt.err (!%p451_p2)
}
 0x101   :  { %s484_s29 = smov [#allocation5]   ;;  %v284_v7 = vld [vmem:[%s708_s7] ss:$0 sm:$0xff]  ;;  %s485_s13 = smov [#allocation2]  }
 0x102   :  { %268 = dma.smem_to_hbm %s484_s29, 16, %s710_s9, [#allocation4]  }
 0x103   :  { %s257_s14 = sshll.u32 %s485_s13, 4  ;;  %s258_s14 = int_to_ptr.vmem [resolvable:$true] %s257_s14 }
 0x104   :  { %s455_s15 = scalar_lea.vmem %s258_s14, 128  ;;  %p460_p4 = scmp.lt.s32.totalorder %s258_s14, %s258_s14 }
 0x105   :  { %p456_p3 = scmp.ne.s32.totalorder %s258_s14, %s455_s15  ;;  %p461_p5 = scmp.lt.s32.totalorder %s455_s15, %s455_s15 }
 0x107   :  { %p462_p6 = por %p461_p5, %p460_p4 }
 0x109   :  { %p463_p7 = pnand %p462_p6, %p456_p3 }
 0x1d2   :  { %v242_v8 = vpop.f32.mrb[0].mxu1 }
 0x1d3   :  { %v243_v9 = vadd.f32 %v284_v7, %v242_v8  ;;  %v389_v10 = vpop.f32.mrb[1].mxu1 }
 0x1d5   :  { %vm246_vm1 = vcmp.ge.f32.partialorder %v243_v9, 1.0 }
 0x1d6   :  { %v285_v11 = vsel %vm246_vm1, 1.0, %v483_v6 }
 0x1d7   :  { %249 = vst [vmem:[#allocation2] sm:$0xff] %v285_v11 }
 0x1d8   :  { %466 = shalt.err (!%p463_p7)
}
 0x1d9   :  { %s467_s7 = scalar_lea.hbm %s709_s8, 128 }
 0x1da   :  { %p468_p8 = scmp.ne.s32.totalorder %s709_s8, %s467_s7  ;;  %p471_p9 = scmp.lt.u32.totalorder %s467_s7, %s709_s8 }
 0x1dc   :  { %p473_p10 = pnand %p471_p9, %p468_p8 }
 0x1de   :  { %476 = shalt.err (!%p473_p10)
}
 0x1df   :  { %260 = dma.vmem_to_hbm [thread:$0]  %s258_s14, 128, %s709_s8, [#allocation3]  }
 0x1e0   :  { %477 = dma.done.wait [#allocation3], 128  }
 0x1e1   :  { %478 = vsyncadd [#allocation3], 4294967168 }
 0x1e2   :  { %479 = dma.done.wait [#allocation4], 16  }
 0x1e3   :  { %480 = vsyncadd [#allocation4], 4294967280 }
 0x1e4   :  { %279 = sfence }
 0x1e5   :  { %280 = vsyncpa [#allocation3], 1 }
 0x1e6   :  { %281 = vsyncpa [#allocation4], 1 }

</bundles_post_ra>
